<compile_context>
chip_gen: v7x
topology: tpu7x:2x2x1
jax: 0.10.0
libtpu: 0.0.40
codegen_flags: <defaults>
</compile_context>

<pallas_src>
import jax
import jax.numpy as jnp
from jax import lax
from jax.experimental import pallas as pl
from jax.experimental.pallas import tpu as pltpu


EPS = 1e-12  # matches torch.nn.functional.normalize default


# --------------------------------------------------------------------------- #
# Kernels
# --------------------------------------------------------------------------- #
def _make_resident_kernel(compute_dtype):
    """Projection + bias + L2 normalize with the whole weight resident in VMEM."""
    def kernel(feat_ref, w_ref, b_ref, out_ref):
        x = feat_ref[...].astype(compute_dtype)       # in-kernel cast (VPU, hidden)
        w = w_ref[...].astype(compute_dtype)          # no-op if weight pre-cast
        y = jnp.dot(x, w, preferred_element_type=jnp.float32)
        y = y + b_ref[...].astype(jnp.float32)
        # y / max(||y||, eps)  ==  y * rsqrt(max(||y||^2, eps^2)); rsqrt -> EUP slot.
        sq = jnp.sum(y * y, axis=-1, keepdims=True)
        inv = lax.rsqrt(jnp.maximum(sq, jnp.float32(EPS * EPS)))
        out_ref[...] = (y * inv).astype(out_ref.dtype)
    return kernel


def _make_ksplit_kernel(compute_dtype):
    """Same op with the contraction dim split over the last grid axis (f32 acc)."""
    def kernel(feat_ref, w_ref, b_ref, out_ref, acc_ref):
        k = pl.program_id(1)

        @pl.when(k == 0)
        def _():
            acc_ref[...] = jnp.zeros_like(acc_ref)

        x = feat_ref[...].astype(compute_dtype)
        w = w_ref[...].astype(compute_dtype)
        acc_ref[...] += jnp.dot(x, w, preferred_element_type=jnp.float32)

        @pl.when(k == pl.num_programs(1) - 1)
        def _():
            y = acc_ref[...] + b_ref[...].astype(jnp.float32)
            sq = jnp.sum(y * y, axis=-1, keepdims=True)
            inv = lax.rsqrt(jnp.maximum(sq, jnp.float32(EPS * EPS)))
            out_ref[...] = (y * inv).astype(out_ref.dtype)
    return kernel


# --------------------------------------------------------------------------- #
# Helpers
# --------------------------------------------------------------------------- #
def _round_up(x, m):
    return ((x + m - 1) // m) * m


def _cdiv(a, b):
    return -(-a // b)


def _tpu_vmem_capacity_bytes():
    try:
        return int(pltpu.get_tpu_info().vmem_capacity_bytes)
    except Exception:
        return 64 << 20  # conservative fallback (v7x per-TC VMEM)


def _batch_tile_cap():
    """128 on v5-class chips (4x128 MXU), 256 on v6e/v7x (2x256 MXU)."""
    try:
        kind = jax.devices()[0].device_kind.lower()
    except Exception:
        kind = ""
    return 128 if "v5" in kind else 256


def _choose_batch_tile(B, cap):
    """16-aligned (bf16 sublane pack), padding-minimizing batch tile."""
    if B <= 8:
        return 8
    n_steps = _cdiv(B, cap)
    tb = _round_up(_cdiv(B, n_steps), 16)
    return min(tb, cap)


def prepare_projector_params(weight_t, bias, param_dtype=None):
    """One-time (init) parameter prep.

    Pads the output dim to a multiple of 128 (lane-dense stores; zero columns
    project to exact zeros and do not change the L2 norm) and optionally
    pre-casts the weight to the MXU compute dtype so the per-step in-kernel
    cast becomes a no-op.
    Returns (weight_padded [D_in, D_out_p], bias_padded [1, D_out_p] f32, d_out).
    """
    d_in, d_out = weight_t.shape
    d_out_p = _round_up(d_out, 128)
    if d_out_p != d_out:
        weight_t = jnp.pad(weight_t, ((0, 0), (0, d_out_p - d_out)))
        bias = jnp.pad(bias, (0, d_out_p - d_out))
    if param_dtype is not None:
        weight_t = weight_t.astype(param_dtype)
    bias2d = bias.reshape(1, d_out_p).astype(jnp.float32)
    return weight_t, bias2d, d_out


# --------------------------------------------------------------------------- #
# Wrapper
# --------------------------------------------------------------------------- #
def modality_encoder_apply(features, weight_p, bias_p, d_out, *,
                           compute_dtype=jnp.bfloat16, tb=None, tk=None,
                           force_k_split=False):
    """Hot path. features: [B, D_in]; weight_p: [D_in, D_out_p] (pre-padded,
    pre-transposed); bias_p: [1, D_out_p] f32; d_out: logical output dim."""
    B, d_in = features.shape
    d_in_w, d_out_p = weight_p.shape
    assert d_in_w == d_in, "weight/features contraction-dim mismatch"
    assert d_out_p % 128 == 0, "weight output dim must be padded to 128"
    out_dtype = features.dtype

    cap = _batch_tile_cap()
    if tb is None:
        tb = _choose_batch_tile(B, cap)
    grid_b = _cdiv(B, tb)

    c_bytes = jnp.dtype(compute_dtype).itemsize
    f_bytes = features.dtype.itemsize
    w_bytes = weight_p.dtype.itemsize
    o_bytes = features.dtype.itemsize

    vmem_cap = _tpu_vmem_capacity_bytes()
    vmem_allow = (vmem_cap * 7) // 8   # leave headroom for Mosaic internal scratch

    # Resident-weight footprint: single-buffered weight (+ in-kernel cast copy if the
    # weight is not already in compute_dtype), double-buffered streams, the live f32
    # y tile, and fixed headroom.
    w_cast_copy = 0 if weight_p.dtype == jnp.dtype(compute_dtype) else d_in * d_out_p * c_bytes
    resident_bytes = (d_in * d_out_p * w_bytes + w_cast_copy
                      + 2 * tb * d_in * f_bytes + tb * d_in * c_bytes
                      + 2 * tb * d_out_p * o_bytes
                      + tb * d_out_p * 4
                      + 2 * d_out_p * 4
                      + (4 << 20))

    use_k_split = force_k_split or (resident_bytes > vmem_allow)

    cost = pl.CostEstimate(
        flops=2 * B * d_in * d_out_p,
        transcendentals=B,
        bytes_accessed=(B * d_in * f_bytes + d_in * d_out_p * w_bytes
                        + d_out_p * 4 + B * d_out_p * o_bytes),
    )

    if not use_k_split:
        vmem_limit = int(min(max(resident_bytes, 32 << 20), vmem_allow))

        def run(single_buffer_invariants):
            inv_kwargs = (dict(pipeline_mode=pl.Buffered(1))
                          if single_buffer_invariants else {})
            return pl.pallas_call(
                _make_resident_kernel(compute_dtype),
                out_shape=jax.ShapeDtypeStruct((B, d_out_p), out_dtype),
                grid_spec=pltpu.PrefetchScalarGridSpec(
                    num_scalar_prefetch=0,
                    grid=(grid_b,),
                    in_specs=[
                        pl.BlockSpec((tb, d_in), lambda i: (i, 0)),                 # streamed
                        pl.BlockSpec((d_in, d_out_p), lambda i: (0, 0), **inv_kwargs),  # resident
                        pl.BlockSpec((1, d_out_p), lambda i: (0, 0), **inv_kwargs),     # resident
                    ],
                    out_specs=pl.BlockSpec((tb, d_out_p), lambda i: (i, 0)),
                ),
                compiler_params=pltpu.CompilerParams(
                    dimension_semantics=("parallel",),
                    vmem_limit_bytes=vmem_limit,
                ),
                cost_estimate=cost,
            )(features, weight_p, bias_p)

        try:
            out = run(True)
        except Exception:
            # Fallback if pl.Buffered(1) single-buffering is rejected on this jax build.
            out = run(False)
    else:
        # K-split path: weight streamed in (tk, D_out_p) slabs along the last grid axis.
        if tk is None:
            tk = min(512, _round_up(d_in, 128))
        tk = _round_up(tk, 128)
        d_in_p = _round_up(d_in, tk)
        feat_in, w_in = features, weight_p
        if d_in_p != d_in:
            # Zero padding along the contraction dim is exact (contributes nothing).
            feat_in = jnp.pad(features, ((0, 0), (0, d_in_p - d_in)))
            w_in = jnp.pad(weight_p, ((0, d_in_p - d_in), (0, 0)))
        grid_k = d_in_p // tk

        ksplit_bytes = (2 * tb * tk * f_bytes + tb * tk * c_bytes
                        + 2 * tk * d_out_p * w_bytes
                        + (0 if w_in.dtype == jnp.dtype(compute_dtype)
                           else tk * d_out_p * c_bytes)
                        + 2 * tb * d_out_p * o_bytes + 2 * tb * d_out_p * 4
                        + 2 * d_out_p * 4 + (4 << 20))
        vmem_limit = int(min(max(ksplit_bytes, 32 << 20), vmem_allow))

        def run_ksplit(single_buffer_invariants):
            inv_kwargs = (dict(pipeline_mode=pl.Buffered(1))
                          if single_buffer_invariants else {})
            return pl.pallas_call(
                _make_ksplit_kernel(compute_dtype),
                out_shape=jax.ShapeDtypeStruct((B, d_out_p), out_dtype),
                grid_spec=pltpu.PrefetchScalarGridSpec(
                    num_scalar_prefetch=0,
                    grid=(grid_b, grid_k),
                    in_specs=[
                        pl.BlockSpec((tb, tk), lambda i, k: (i, k)),
                        pl.BlockSpec((tk, d_out_p), lambda i, k: (k, 0)),
                        pl.BlockSpec((1, d_out_p), lambda i, k: (0, 0), **inv_kwargs),
                    ],
                    out_specs=pl.BlockSpec((tb, d_out_p), lambda i, k: (i, 0)),
                    scratch_shapes=[pltpu.VMEM((tb, d_out_p), jnp.float32)],
                ),
                compiler_params=pltpu.CompilerParams(
                    dimension_semantics=("parallel", "arbitrary"),
                    vmem_limit_bytes=vmem_limit,
                ),
                cost_estimate=cost,
            )(feat_in, w_in, bias_p)

        try:
            out = run_ksplit(True)
        except Exception:
            out = run_ksplit(False)

    if d_out != d_out_p:
        out = out[:, :d_out]
    return out


def modality_encoder(features, weight_t, bias, *, compute_dtype=jnp.bfloat16, **kwargs):
    """Convenience one-shot wrapper (prepare + apply). In real use, call
    prepare_projector_params() once at init and modality_encoder_apply() per step."""
    w_p, b_p, d_out = prepare_projector_params(weight_t, bias)
    return modality_encoder_apply(features, w_p, b_p, d_out,
                                  compute_dtype=compute_dtype, **kwargs)


# --------------------------------------------------------------------------- #
# Reference + tests
# --------------------------------------------------------------------------- #
def _reference(features, weight_t, bias):
    y = features.astype(jnp.float32) @ weight_t.astype(jnp.float32)
    y = y + bias.astype(jnp.float32)[None, :]
    denom = jnp.maximum(jnp.linalg.norm(y, axis=1, keepdims=True), EPS)
    return y / denom


if __name__ == "__main__":
    key = jax.random.PRNGKey(0)
    k_feat, k_w, k_b = jax.random.split(key, 3)

    B = 8            # batch
    D_in = 32        # encoder.output_dim
    D_out = 128      # projector output_dim

    # Deterministic parameter init (mirrors nn.Linear's uniform(-1/sqrt(fan_in), ..))
    bound = 1.0 / jnp.sqrt(jnp.float32(D_in))
    weight_t = jax.random.uniform(k_w, (D_in, D_out), jnp.float32, -bound, bound)
    bias = jax.random.uniform(k_b, (D_out,), jnp.float32, -bound, bound)

    # Synthetic encoder features (stand-in for encoder(*args, **kwargs) output)
    features = jax.random.normal(k_feat, (B, D_in), jnp.float32)
    ref = _reference(features, weight_t, bias)

    # 1) Perf path: params prepared once (padded + bf16), bf16 MXU, f32 accumulate/norm.
    w_p, b_p, d_out = prepare_projector_params(weight_t, bias, param_dtype=jnp.bfloat16)
    out_bf16 = jax.block_until_ready(modality_encoder_apply(features, w_p, b_p, d_out))
    assert out_bf16.shape == (B, D_out)
    assert jnp.allclose(out_bf16, ref, atol=5e-3), float(jnp.max(jnp.abs(out_bf16 - ref)))

    # 2) f32 compute path (convenience wrapper, in-kernel no-op cast), tight tolerance.
    out_f32 = jax.block_until_ready(
        modality_encoder(features, weight_t, bias, compute_dtype=jnp.float32))
    assert jnp.allclose(out_f32, ref, atol=1e-5, rtol=1e-5)

    # 3) Ragged batch + non-multiple-of-128 output dim:
    #    exercises the masked partial batch block and the column pad/slice path.
    B2, D_out2 = 10, 96
    w2 = jax.random.uniform(k_w, (D_in, D_out2), jnp.float32, -bound, bound)
    b2 = jax.random.uniform(k_b, (D_out2,), jnp.float32, -bound, bound)
    f2 = jax.random.normal(k_feat, (B2, D_in), jnp.float32)
    out2 = jax.block_until_ready(
        modality_encoder(f2, w2, b2, compute_dtype=jnp.float32))
    assert out2.shape == (B2, D_out2)
    assert jnp.allclose(out2, _reference(f2, w2, b2), atol=1e-5, rtol=1e-5)

    # 4) K-split path (forced at small scale): grid=(B/tb, D_in/tk), f32 accumulator.
    D_in3 = 256
    bound3 = 1.0 / jnp.sqrt(jnp.float32(D_in3))
    w3 = jax.random.uniform(k_w, (D_in3, D_out), jnp.float32, -bound3, bound3)
    b3 = jax.random.uniform(k_b, (D_out,), jnp.float32, -bound3, bound3)
    f3 = jax.random.normal(k_feat, (B, D_in3), jnp.float32)
    out3 = jax.block_until_ready(
        modality_encoder(f3, w3, b3, compute_dtype=jnp.float32,
                         force_k_split=True, tk=128))
    assert jnp.allclose(out3, _reference(f3, w3, b3), atol=1e-5, rtol=1e-5)

    print("KERNEL_OK")
</pallas_src>

<mosaic_0001>
module attributes {stable_mosaic.version = 11 : i64} {
  func.func @kernel(%arg0: i32, %arg1: memref<8x32xf32, #tpu.memory_space<vmem>>, %arg2: memref<32x128xbf16, #tpu.memory_space<vmem>>, %arg3: memref<1x128xf32, #tpu.memory_space<vmem>>, %arg4: memref<8x128xf32, #tpu.memory_space<vmem>>) attributes {dimension_semantics = [#tpu.dimension_semantics<parallel>], iteration_bounds = array<i64: 1>, scalar_prefetch = 0 : i64, scratch_operands = 0 : i64, tpu.core_type = #tpu.core_type<tc>, window_params = [{transform_indices = @transform_0, window_bounds = array<i64: 8, 32>}, {pipeline_mode = #tpu.pipeline_mode<synchronous>, transform_indices = @transform_1, window_bounds = array<i64: 32, 128>}, {pipeline_mode = #tpu.pipeline_mode<synchronous>, transform_indices = @transform_2, window_bounds = array<i64: 1, 128>}, {transform_indices = @transform_3, window_bounds = array<i64: 8, 128>}]} {
    %c0 = arith.constant 0 : index
    %c0_0 = arith.constant 0 : index
    %0 = vector.load %arg1[%c0, %c0_0] : memref<8x32xf32, #tpu.memory_space<vmem>>, vector<8x32xf32>
    %1 = arith.truncf %0 : vector<8x32xf32> to vector<8x32xbf16>
    %c0_1 = arith.constant 0 : index
    %c0_2 = arith.constant 0 : index
    %2 = vector.load %arg2[%c0_1, %c0_2] : memref<32x128xbf16, #tpu.memory_space<vmem>>, vector<32x128xbf16>
    %cst = arith.constant dense<0.000000e+00> : vector<8x128xf32>
    %3 = tpu.matmul %1, %2, %cst {dimension_numbers = #tpu.dot_dimension_numbers<[1], [0], [0], [1], [0, 0, 1, 1], [], []>} : vector<8x32xbf16>, vector<32x128xbf16>, vector<8x128xf32> -> vector<8x128xf32>
    %c0_3 = arith.constant 0 : index
    %c0_4 = arith.constant 0 : index
    %4 = vector.load %arg3[%c0_3, %c0_4] : memref<1x128xf32, #tpu.memory_space<vmem>>, vector<1x128xf32>
    %5 = vector.broadcast %4 : vector<1x128xf32> to vector<8x128xf32>
    %6 = arith.addf %3, %5 : vector<8x128xf32>
    %7 = arith.mulf %6, %6 : vector<8x128xf32>
    %cst_5 = arith.constant dense<0.000000e+00> : vector<8xf32>
    %8 = vector.multi_reduction <add>, %7, %cst_5 [1] : vector<8x128xf32> to vector<8xf32>
    %9 = vector.shape_cast %8 : vector<8xf32> to vector<8x1xf32>
    %cst_6 = arith.constant 1.000000e-24 : f32
    %10 = vector.broadcast %cst_6 : f32 to vector<8x1xf32>
    %11 = arith.maximumf %9, %10 : vector<8x1xf32>
    %12 = math.rsqrt %11 : vector<8x1xf32>
    %13 = vector.broadcast %12 : vector<8x1xf32> to vector<8x128xf32>
    %14 = arith.mulf %6, %13 : vector<8x128xf32>
    %c0_7 = arith.constant 0 : index
    %c0_8 = arith.constant 0 : index
    %15 = vector.load %arg4[%c0_7, %c0_8] : memref<8x128xf32, #tpu.memory_space<vmem>>, vector<8x128xf32>
    tpu.vector_store %arg4[%c0_7, %c0_8], %14 {strides = array<i32>} : memref<8x128xf32, #tpu.memory_space<vmem>>, vector<8x128xf32>,
    return
  }
  func.func @transform_0(%arg0: i32) -> (i32, i32) {
    %c0_i32 = arith.constant 0 : i32
    %c0_i32_0 = arith.constant 0 : i32
    return %arg0, %c0_i32 : i32, i32
  }
  func.func @transform_1(%arg0: i32) -> (i32, i32) {
    %c0_i32 = arith.constant 0 : i32
    %c0_i32_0 = arith.constant 0 : i32
    %c0_i32_1 = arith.constant 0 : i32
    return %c0_i32, %c0_i32_0 : i32, i32
  }
  func.func @transform_2(%arg0: i32) -> (i32, i32) {
    %c0_i32 = arith.constant 0 : i32
    %c0_i32_0 = arith.constant 0 : i32
    %c0_i32_1 = arith.constant 0 : i32
    return %c0_i32, %c0_i32_0 : i32, i32
  }
  func.func @transform_3(%arg0: i32) -> (i32, i32) {
    %c0_i32 = arith.constant 0 : i32
    %c0_i32_0 = arith.constant 0 : i32
    return %arg0, %c0_i32 : i32, i32
  }
}

module attributes {stable_mosaic.version = 11 : i64} {
  func.func @kernel(%arg0: i32, %arg1: memref<8x32xf32, #tpu.memory_space<vmem>>, %arg2: memref<32x128xbf16, #tpu.memory_space<vmem>>, %arg3: memref<1x128xf32, #tpu.memory_space<vmem>>, %arg4: memref<8x128xf32, #tpu.memory_space<vmem>>) attributes {dimension_semantics = [#tpu.dimension_semantics<parallel>], iteration_bounds = array<i64: 1>, scalar_prefetch = 0 : i64, scratch_operands = 0 : i64, tpu.core_type = #tpu.core_type<tc>, window_params = [{transform_indices = @transform_0, window_bounds = array<i64: 8, 32>}, {pipeline_mode = #tpu.pipeline_mode<synchronous>, transform_indices = @transform_1, window_bounds = array<i64: 32, 128>}, {pipeline_mode = #tpu.pipeline_mode<synchronous>, transform_indices = @transform_2, window_bounds = array<i64: 1, 128>}, {transform_indices = @transform_3, window_bounds = array<i64: 8, 128>}]} {
    %c0 = arith.constant 0 : index
    %c0_0 = arith.constant 0 : index
    %0 = vector.load %arg1[%c0, %c0_0] : memref<8x32xf32, #tpu.memory_space<vmem>>, vector<8x32xf32>
    %1 = arith.truncf %0 : vector<8x32xf32> to vector<8x32xbf16>
    %c0_1 = arith.constant 0 : index
    %c0_2 = arith.constant 0 : index
    %2 = vector.load %arg2[%c0_1, %c0_2] : memref<32x128xbf16, #tpu.memory_space<vmem>>, vector<32x128xbf16>
    %cst = arith.constant dense<0.000000e+00> : vector<8x128xf32>
    %3 = tpu.matmul %1, %2, %cst {dimension_numbers = #tpu.dot_dimension_numbers<[1], [0], [0], [1], [0, 0, 1, 1], [], []>} : vector<8x32xbf16>, vector<32x128xbf16>, vector<8x128xf32> -> vector<8x128xf32>
    %c0_3 = arith.constant 0 : index
    %c0_4 = arith.constant 0 : index
    %4 = vector.load %arg3[%c0_3, %c0_4] : memref<1x128xf32, #tpu.memory_space<vmem>>, vector<1x128xf32>
    %5 = vector.broadcast %4 : vector<1x128xf32> to vector<8x128xf32>
    %6 = arith.addf %3, %5 : vector<8x128xf32>
    %7 = arith.mulf %6, %6 : vector<8x128xf32>
    %cst_5 = arith.constant dense<0.000000e+00> : vector<8xf32>
    %8 = vector.multi_reduction <add>, %7, %cst_5 [1] : vector<8x128xf32> to vector<8xf32>
    %9 = vector.shape_cast %8 : vector<8xf32> to vector<8x1xf32>
    %cst_6 = arith.constant 1.000000e-24 : f32
    %10 = vector.broadcast %cst_6 : f32 to vector<8x1xf32>
    %11 = arith.maximumf %9, %10 : vector<8x1xf32>
    %12 = math.rsqrt %11 : vector<8x1xf32>
    %13 = vector.broadcast %12 : vector<8x1xf32> to vector<8x128xf32>
    %14 = arith.mulf %6, %13 : vector<8x128xf32>
    %c0_7 = arith.constant 0 : index
    %c0_8 = arith.constant 0 : index
    %15 = vector.load %arg4[%c0_7, %c0_8] : memref<8x128xf32, #tpu.memory_space<vmem>>, vector<8x128xf32>
    tpu.vector_store %arg4[%c0_7, %c0_8], %14 {strides = array<i32>} : memref<8x128xf32, #tpu.memory_space<vmem>>, vector<8x128xf32>,
    return
  }
  func.func @transform_0(%arg0: i32) -> (i32, i32) {
    %c0_i32 = arith.constant 0 : i32
    %c0_i32_0 = arith.constant 0 : i32
    return %arg0, %c0_i32 : i32, i32
  }
  func.func @transform_1(%arg0: i32) -> (i32, i32) {
    %c0_i32 = arith.constant 0 : i32
    %c0_i32_0 = arith.constant 0 : i32
    %c0_i32_1 = arith.constant 0 : i32
    return %c0_i32, %c0_i32_0 : i32, i32
  }
  func.func @transform_2(%arg0: i32) -> (i32, i32) {
    %c0_i32 = arith.constant 0 : i32
    %c0_i32_0 = arith.constant 0 : i32
    %c0_i32_1 = arith.constant 0 : i32
    return %c0_i32, %c0_i32_0 : i32, i32
  }
  func.func @transform_3(%arg0: i32) -> (i32, i32) {
    %c0_i32 = arith.constant 0 : i32
    %c0_i32_0 = arith.constant 0 : i32
    return %arg0, %c0_i32 : i32, i32
  }
}

</mosaic_0001>

<bundles_post_ra>
// kernel: tpu_custom_call.1
= control target key start
LH: loop header
LB: loop body
LE: loop exit
PB: predicated region body
PF: predicated region fallthrough
CT: control target
= control target key end

     0   :  { %8 = vsyncpa [#allocation3], 0  ;;  %s305_s0 = inlined_call_operand.hbm [shape: f32[8,32], index: 0, kind: input, shape index: {}]   ;;  %s306_s1 = inlined_call_operand.hbm [shape: bf16[32,128], index: 1, kind: input, shape index: {}]   ;;  %s307_s2 = inlined_call_operand.vmem [shape: f32[1,128], index: 2, kind: input, shape index: {}]   ;;  %s308_s3 = inlined_call_operand.hbm [shape: f32[8,128], index: 3, kind: output, shape index: {}]  }
   0x1   :  { %9 = vsyncpa [#allocation6], 0 }
   0x2   :  { %10 = vsyncpa [#allocation4], 0  ;;  %s232_s12 = smov [#allocation2]   ;;  %s233_s14 = smov [#allocation5]  }
   0x3   :  { %s17_s13 = sshll.u32 %s232_s12, 4  ;;  %s26_s15 = sshll.u32 %s233_s14, 4  ;;  %s18_s13 = int_to_ptr.vmem [resolvable:$true] %s17_s13  ;;  %s259_s15 = int_to_ptr.vmem [resolvable:$true] %s26_s15 }
   0x4   :  { %s160_s18 = scalar_lea.hbm %s305_s0, 128 }
   0x5   :  { %p161_p0 = scmp.ne.s32.totalorder %s305_s0, %s160_s18  ;;  %p164_p1 = scmp.lt.u32.totalorder %s160_s18, %s305_s0 }
   0x7   :  { %p166_p2 = pnand %p164_p1, %p161_p0 }
   0x9   :  { %169 = shalt.err (!%p166_p2)
}
   0xa   :  { %s170_s23 = scalar_lea.vmem %s18_s13, 128  ;;  %p175_p4 = scmp.lt.s32.totalorder %s18_s13, %s18_s13 }
   0xb   :  { %p171_p3 = scmp.ne.s32.totalorder %s18_s13, %s170_s23  ;;  %p176_p5 = scmp.lt.s32.totalorder %s170_s23, %s170_s23 }
   0xd   :  { %p177_p6 = por %p176_p5, %p175_p4 }
   0xf   :  { %p178_p7 = pnand %p177_p6, %p171_p3 }
  0x11   :  { %181 = shalt.err (!%p178_p7)
}
  0x12   :  { %20 = dma.hbm_to_vmem [thread:$0]  %s305_s0, 128, %s18_s13, [#allocation3]  }
  0x13   :  { %s182_s28 = scalar_lea.hbm %s306_s1, 256 }
  0x14   :  { %p183_p8 = scmp.ne.s32.totalorder %s306_s1, %s182_s28  ;;  %p186_p9 = scmp.lt.u32.totalorder %s182_s28, %s306_s1 }
  0x16   :  { %p188_p10 = pnand %p186_p9, %p183_p8 }
  0x18   :  { %191 = shalt.err (!%p188_p10)
}
  0x19   :  { %s192_s6 = scalar_lea.vmem %s259_s15, 256  ;;  %p197_p12 = scmp.lt.s32.totalorder %s259_s15, %s259_s15 }
  0x1a   :  { %p193_p11 = scmp.ne.s32.totalorder %s259_s15, %s192_s6  ;;  %p198_p13 = scmp.lt.s32.totalorder %s192_s6, %s192_s6 }
  0x1c   :  { %p199_p0 = por %p198_p13, %p197_p12 }
  0x1e   :  { %p200_p1 = pnand %p199_p0, %p193_p11 }
  0x20   :  { %203 = shalt.err (!%p200_p1)
}
  0x21   :  { %s234_s0 = smov 64   ;;  %s235_s7 = smov 4  }
  0x22   :  { %32 = dma.hbm_to_vmem [thread:$0]  %s306_s1, 256, %s259_s15, [#allocation6], %s234_s0, %s234_s0, %s235_s7  }
  0x23   :  { %226 = dma.done.wait [#allocation3], 128  }
  0x24   :  { %227 = vsyncadd [#allocation3], 4294967168 }
  0x25   :  { %228 = dma.done.wait [#allocation6], 256  }
  0x26   :  { %229 = vsyncadd [#allocation6], 4294967040  ;;  %v236_v0 = vmov 0.0   ;;  %vm237_vm0 = vmmov 0   ;;  %v156_v1 = vld [vmem:[#allocation5] sm:$0xff]   ;;  %v157_v2 = vld [vmem:[#allocation5 + $0x8] sm:$0xff]  }
  0x27   :  { %141 = vmatprep.subr.bf16.mxu0 %v236_v0  ;;  %145 = vmatprep.mubr.msk.bf16.mxu0 %vm237_vm0, %v236_v0  ;;  %v42_v3 = vld [vmem:[#allocation2] sm:$0xff]  ;;  %vm67_vm1 = vcmask 261120   ;;  %s238_s1 = smov [#allocation7]  }
  0x28   :  { %142 = vmatpush3.bf16.msra.mxu0 %v156_v1  ;;  %v43_v4 = vpack.c.bf16 %v42_v3, %v42_v3  ;;  %v134_v5 = vld [vmem:[%s307_s2] ss:$0 sm:$0xff]  ;;  %s124_s12 = sshll.u32 %s238_s1, 4  ;;  %s125_s12 = int_to_ptr.vmem [resolvable:$true] %s124_s12 }
  0x29   :  { %143 = vmatprep.subr.bf16.mxu0 %v236_v0  ;;  %s204_s13 = scalar_lea.vmem %s125_s12, 128  ;;  %p209_p3 = scmp.lt.s32.totalorder %s125_s12, %s125_s12 }
  0x2a   :  { %p205_p2 = scmp.ne.s32.totalorder %s125_s12, %s204_s13  ;;  %p210_p4 = scmp.lt.s32.totalorder %s204_s13, %s204_s13 }
  0x2c   :  { %144 = vmatpush3.bf16.msra.mxu0 %v157_v2  ;;  %p211_p5 = por %p210_p4, %p209_p3 }
  0x2e   :  { %p212_p6 = pnand %p211_p5, %p205_p2 }
  0x2f   :  { %146 = vmatmul.mubr.msk.bf16.vlgmr.msra.gmra.mrb[0].mxu0 %vm67_vm1, %v43_v4 }
 0x102   :  { %v105_v6 = vpop.f32.mrb[0].mxu0 }
 0x103   :  { %v106_v7 = vadd.f32 %v134_v5, %v105_v6  ;;  %v147_v8 = vpop.f32.mrb[1].mxu0 }
 0x104   :  { %v108_v9 = vpop.f32.mrb[2].mxu0 }
 0x105   :  { %v148_v10 = vpop.f32.mrb[3].mxu0  ;;  %v111_v11 = vmul.f32 %v106_v7, %v106_v7 }
 0x107   :  { %112 = vadd.xlane.f32.xlu0 %v111_v11 }
 0x194   :  { %v113_v12 = vpop.xlane.xlu0 %112 }
 0x195   :  { %v114_v13 = vmax.f32 %v113_v12, 1e-24 }
 0x197   :  { %158 = vrsqrt.f32 %v114_v13 }
 0x1a1   :  { %v159_v14 = vpop.eup %158 }
 0x1a2   :  { %v116_v15 = vmul.f32 %v159_v14, %v106_v7 }
 0x1a4   :  { %117 = vst [vmem:[#allocation7] sm:$0xff] %v116_v15 }
 0x1a5   :  { %215 = shalt.err (!%p212_p6)
}
 0x1a6   :  { %s216_s15 = scalar_lea.hbm %s308_s3, 128 }
 0x1a7   :  { %p217_p7 = scmp.ne.s32.totalorder %s308_s3, %s216_s15  ;;  %p220_p8 = scmp.lt.u32.totalorder %s216_s15, %s308_s3 }
 0x1a9   :  { %p222_p9 = pnand %p220_p8, %p217_p7 }
 0x1ab   :  { %225 = shalt.err (!%p222_p9)
}
 0x1ac   :  { %127 = dma.vmem_to_hbm [thread:$0]  %s125_s12, 128, %s308_s3, [#allocation4]  }
 0x1ad   :  { %230 = dma.done.wait [#allocation4], 128  }
 0x1ae   :  { %231 = vsyncadd [#allocation4], 4294967168 }
 0x1af   :  { %131 = vsyncpa [#allocation3], 1 }
 0x1b0   :  { %132 = vsyncpa [#allocation6], 1 }
 0x1b1   :  { %133 = vsyncpa [#allocation4], 1 }

// kernel: tpu_custom_call.1
= control target key start
LH: loop header
LB: loop body
LE: loop exit
PB: predicated region body
PF: predicated region fallthrough
CT: control target
= control target key end

     0   :  { %8 = vsyncpa [#allocation3], 0  ;;  %s305_s0 = inlined_call_operand.hbm [shape: f32[8,32], index: 0, kind: input, shape index: {}]   ;;  %s306_s1 = inlined_call_operand.hbm [shape: bf16[32,128], index: 1, kind: input, shape index: {}]   ;;  %s307_s2 = inlined_call_operand.vmem [shape: f32[1,128], index: 2, kind: input, shape index: {}]   ;;  %s308_s3 = inlined_call_operand.hbm [shape: f32[8,128], index: 3, kind: output, shape index: {}]  }
   0x1   :  { %9 = vsyncpa [#allocation6], 0 }
   0x2   :  { %10 = vsyncpa [#allocation4], 0  ;;  %s232_s12 = smov [#allocation2]   ;;  %s233_s14 = smov [#allocation5]  }
   0x3   :  { %s17_s13 = sshll.u32 %s232_s12, 4  ;;  %s26_s15 = sshll.u32 %s233_s14, 4  ;;  %s18_s13 = int_to_ptr.vmem [resolvable:$true] %s17_s13  ;;  %s259_s15 = int_to_ptr.vmem [resolvable:$true] %s26_s15 }
   0x4   :  { %s160_s18 = scalar_lea.hbm %s305_s0, 128 }
   0x5   :  { %p161_p0 = scmp.ne.s32.totalorder %s305_s0, %s160_s18  ;;  %p164_p1 = scmp.lt.u32.totalorder %s160_s18, %s305_s0 }
   0x7   :  { %p166_p2 = pnand %p164_p1, %p161_p0 }
   0x9   :  { %169 = shalt.err (!%p166_p2)
}
   0xa   :  { %s170_s23 = scalar_lea.vmem %s18_s13, 128  ;;  %p175_p4 = scmp.lt.s32.totalorder %s18_s13, %s18_s13 }
   0xb   :  { %p171_p3 = scmp.ne.s32.totalorder %s18_s13, %s170_s23  ;;  %p176_p5 = scmp.lt.s32.totalorder %s170_s23, %s170_s23 }
   0xd   :  { %p177_p6 = por %p176_p5, %p175_p4 }
   0xf   :  { %p178_p7 = pnand %p177_p6, %p171_p3 }
  0x11   :  { %181 = shalt.err (!%p178_p7)
}
  0x12   :  { %20 = dma.hbm_to_vmem [thread:$0]  %s305_s0, 128, %s18_s13, [#allocation3]  }
  0x13   :  { %s182_s28 = scalar_lea.hbm %s306_s1, 256 }
  0x14   :  { %p183_p8 = scmp.ne.s32.totalorder %s306_s1, %s182_s28  ;;  %p186_p9 = scmp.lt.u32.totalorder %s182_s28, %s306_s1 }
  0x16   :  { %p188_p10 = pnand %p186_p9, %p183_p8 }
  0x18   :  { %191 = shalt.err (!%p188_p10)
}
  0x19   :  { %s192_s6 = scalar_lea.vmem %s259_s15, 256  ;;  %p197_p12 = scmp.lt.s32.totalorder %s259_s15, %s259_s15 }
  0x1a   :  { %p193_p11 = scmp.ne.s32.totalorder %s259_s15, %s192_s6  ;;  %p198_p13 = scmp.lt.s32.totalorder %s192_s6, %s192_s6 }
  0x1c   :  { %p199_p0 = por %p198_p13, %p197_p12 }
  0x1e   :  { %p200_p1 = pnand %p199_p0, %p193_p11 }
  0x20   :  { %203 = shalt.err (!%p200_p1)
}
  0x21   :  { %s234_s0 = smov 64   ;;  %s235_s7 = smov 4  }
  0x22   :  { %32 = dma.hbm_to_vmem [thread:$0]  %s306_s1, 256, %s259_s15, [#allocation6], %s234_s0, %s234_s0, %s235_s7  }
  0x23   :  { %226 = dma.done.wait [#allocation3], 128  }
  0x24   :  { %227 = vsyncadd [#allocation3], 4294967168 }
  0x25   :  { %228 = dma.done.wait [#allocation6], 256  }
  0x26   :  { %229 = vsyncadd [#allocation6], 4294967040  ;;  %v236_v0 = vmov 0.0   ;;  %vm237_vm0 = vmmov 0   ;;  %v156_v1 = vld [vmem:[#allocation5] sm:$0xff]   ;;  %v157_v2 = vld [vmem:[#allocation5 + $0x8] sm:$0xff]  }
  0x27   :  { %141 = vmatprep.subr.bf16.mxu0 %v236_v0  ;;  %145 = vmatprep.mubr.msk.bf16.mxu0 %vm237_vm0, %v236_v0  ;;  %v42_v3 = vld [vmem:[#allocation2] sm:$0xff]  ;;  %vm67_vm1 = vcmask 261120   ;;  %s238_s1 = smov [#allocation7]  }
  0x28   :  { %142 = vmatpush3.bf16.msra.mxu0 %v156_v1  ;;  %v43_v4 = vpack.c.bf16 %v42_v3, %v42_v3  ;;  %v134_v5 = vld [vmem:[%s307_s2] ss:$0 sm:$0xff]  ;;  %s124_s12 = sshll.u32 %s238_s1, 4  ;;  %s125_s12 = int_to_ptr.vmem [resolvable:$true] %s124_s12 }
  0x29   :  { %143 = vmatprep.subr.bf16.mxu0 %v236_v0  ;;  %s204_s13 = scalar_lea.vmem %s125_s12, 128  ;;  %p209_p3 = scmp.lt.s32.totalorder %s125_s12, %s125_s12 }
  0x2a   :  { %p205_p2 = scmp.ne.s32.totalorder %s125_s12, %s204_s13  ;;  %p210_p4 = scmp.lt.s32.totalorder %s204_s13, %s204_s13 }
  0x2c   :  { %144 = vmatpush3.bf16.msra.mxu0 %v157_v2  ;;  %p211_p5 = por %p210_p4, %p209_p3 }
  0x2e   :  { %p212_p6 = pnand %p211_p5, %p205_p2 }
  0x2f   :  { %146 = vmatmul.mubr.msk.bf16.vlgmr.msra.gmra.mrb[0].mxu0 %vm67_vm1, %v43_v4 }
 0x102   :  { %v105_v6 = vpop.f32.mrb[0].mxu0 }
 0x103   :  { %v106_v7 = vadd.f32 %v134_v5, %v105_v6  ;;  %v147_v8 = vpop.f32.mrb[1].mxu0 }
 0x104   :  { %v108_v9 = vpop.f32.mrb[2].mxu0 }
 0x105   :  { %v148_v10 = vpop.f32.mrb[3].mxu0  ;;  %v111_v11 = vmul.f32 %v106_v7, %v106_v7 }
 0x107   :  { %112 = vadd.xlane.f32.xlu0 %v111_v11 }
 0x194   :  { %v113_v12 = vpop.xlane.xlu0 %112 }
 0x195   :  { %v114_v13 = vmax.f32 %v113_v12, 1e-24 }
 0x197   :  { %158 = vrsqrt.f32 %v114_v13 }
 0x1a1   :  { %v159_v14 = vpop.eup %158 }
 0x1a2   :  { %v116_v15 = vmul.f32 %v159_v14, %v106_v7 }
 0x1a4   :  { %117 = vst [vmem:[#allocation7] sm:$0xff] %v116_v15 }
 0x1a5   :  { %215 = shalt.err (!%p212_p6)
}
 0x1a6   :  { %s216_s15 = scalar_lea.hbm %s308_s3, 128 }
 0x1a7   :  { %p217_p7 = scmp.ne.s32.totalorder %s308_s3, %s216_s15  ;;  %p220_p8 = scmp.lt.u32.totalorder %s216_s15, %s308_s3 }
 0x1a9   :  { %p222_p9 = pnand %p220_p8, %p217_p7 }
 0x1ab   :  { %225 = shalt.err (!%p222_p9)
}
 0x1ac   :  { %127 = dma.vmem_to_hbm [thread:$0]  %s125_s12, 128, %s308_s3, [#allocation4]  }
 0x1ad   :  { %230 = dma.done.wait [#allocation4], 128  }
 0x1ae   :  { %231 = vsyncadd [#allocation4], 4294967168 }
 0x1af   :  { %131 = vsyncpa [#allocation3], 1 }
 0x1b0   :  { %132 = vsyncpa [#allocation6], 1 }
 0x1b1   :  { %133 = vsyncpa [#allocation4], 1 }

</bundles_post_ra>
